<compile_context>
chip_gen: v5e
topology: v5e:2x2
jax: 0.10.0
libtpu: 0.0.40
codegen_flags: <defaults>
</compile_context>

<pallas_src>
import functools

import jax
import jax.numpy as jnp
from jax.experimental import pallas as pl
from jax.experimental.pallas import tpu as pltpu

HIDDEN = 256                        # fc1 / fc2 width
IN_PAD = 16                         # input features 14 -> 16 (bf16 sublane quantum)
OUT_PAD = 128                       # output features 12 -> 128 (lane-dense stores)
W3_FOLD = HIDDEN // 2               # w3 (256,12) folded into (128,256): two halves side by side
W_ROWS = IN_PAD + HIDDEN + W3_FOLD  # 400 rows in the packed bf16 weight slab


def _round_up(x, m):
    return (x + m - 1) // m * m


def _mlp_kernel(x_ref, w_ref, b_ref, o_ref):
    """Fused Linear -> ReLU -> Linear -> ReLU -> Linear.

    x_ref: (TM, IN_PAD)     bf16  activation tile
    w_ref: (W_ROWS, HIDDEN) bf16  packed [w1 (16,256); w2 (256,256); w3 folded (128,256)]
    b_ref: (8, HIDDEN)      f32   biases (rows 0/1/2 = b1 / b2 / b3-padded)
    o_ref: (TM, OUT_PAD)    f32   output tile (true 12 columns sliced off outside)
    """
    x = x_ref[...]  # already bf16; no in-kernel convert

    # fc1 + ReLU  (K = 16)
    h1 = jnp.dot(x, w_ref[0:IN_PAD, :], preferred_element_type=jnp.float32)
    h1 = jnp.maximum(h1 + b_ref[0:1, :], 0.0)

    # fc2 + ReLU  (K = 256)
    h2 = jnp.dot(h1.astype(jnp.bfloat16), w_ref[IN_PAD:IN_PAD + HIDDEN, :],
                 preferred_element_type=jnp.float32)
    h2 = jnp.maximum(h2 + b_ref[1:2, :], 0.0).astype(jnp.bfloat16)

    # fc3: w3's two 128-row halves are packed side by side on the lane axis,
    # so the (TM,256)x(256,128) contraction is two (TM,128)x(128,128) dots.
    w3 = w_ref[IN_PAD + HIDDEN:W_ROWS, :]
    out = (jnp.dot(h2[:, 0:W3_FOLD], w3[:, 0:OUT_PAD],
                   preferred_element_type=jnp.float32)
           + jnp.dot(h2[:, W3_FOLD:HIDDEN], w3[:, OUT_PAD:HIDDEN],
                     preferred_element_type=jnp.float32))
    o_ref[...] = out + b_ref[2:3, 0:OUT_PAD]


def init_params(key, input_size=14, hidden=HIDDEN, output_size=12):
    """PyTorch nn.Linear default init (uniform +/- 1/sqrt(fan_in)), f32."""
    ks = jax.random.split(key, 6)

    def linear(kw, kb, fan_in, fan_out):
        bound = 1.0 / jnp.sqrt(jnp.float32(fan_in))
        w = jax.random.uniform(kw, (fan_in, fan_out), jnp.float32, -bound, bound)
        b = jax.random.uniform(kb, (fan_out,), jnp.float32, -bound, bound)
        return w, b

    w1, b1 = linear(ks[0], ks[1], input_size, hidden)
    w2, b2 = linear(ks[2], ks[3], hidden, hidden)
    w3, b3 = linear(ks[4], ks[5], hidden, output_size)
    return {"w1": w1, "b1": b1, "w2": w2, "b2": b2, "w3": w3, "b3": b3}


def pack_params(params):
    """Pack 6 f32 Linear params into one bf16 weight slab + one f32 bias slab."""
    w1, b1 = params["w1"], params["b1"]
    w2, b2 = params["w2"], params["b2"]
    w3, b3 = params["w3"], params["b3"]
    in_size = w1.shape[0]
    out_size = w3.shape[1]

    # w1: (14,256) -> (16,256), zero-padded rows.
    w1p = jnp.zeros((IN_PAD, HIDDEN), jnp.float32).at[:in_size, :].set(w1)

    # w3: (256,12) folded into (128,256): rows 0:128 in lanes [0:128),
    # rows 128:256 in lanes [128:256); each half zero-padded 12 -> 128 cols.
    w3f = jnp.zeros((W3_FOLD, HIDDEN), jnp.float32)
    w3f = w3f.at[:, 0:out_size].set(w3[:W3_FOLD, :])
    w3f = w3f.at[:, OUT_PAD:OUT_PAD + out_size].set(w3[W3_FOLD:, :])

    w_slab = jnp.concatenate([w1p, w2, w3f], axis=0).astype(jnp.bfloat16)

    b_slab = jnp.zeros((8, HIDDEN), jnp.float32)
    b_slab = b_slab.at[0, :].set(b1)
    b_slab = b_slab.at[1, :].set(b2)
    b_slab = b_slab.at[2, :out_size].set(b3)

    return {"w_slab": w_slab, "b_slab": b_slab,
            "in_size": in_size, "out_size": out_size}


@functools.partial(jax.jit, static_argnames=("in_size", "out_size", "tile_m"))
def _forward_jit(x, w_slab, b_slab, *, in_size, out_size, tile_m):
    B = x.shape[0]
    B_pad = _round_up(B, 8)          # sublane-align the batch only (no tile_m round-up)
    TM = min(tile_m, B_pad)          # big tiles amortize ~0.35 us/grid-step
    n_tiles = pl.cdiv(B_pad, TM)     # partial last tile OK: rows >= B are sliced off

    # Pad batch -> B_pad (zeros), features in_size -> IN_PAD, ship as bf16.
    # Under jit this fuses with the rest of the program (no eager pad dispatch).
    xp = jnp.zeros((B_pad, IN_PAD), jnp.bfloat16).at[:B, :in_size].set(
        x.astype(jnp.bfloat16))

    flops = 2 * B_pad * (IN_PAD * HIDDEN + HIDDEN * HIDDEN + HIDDEN * OUT_PAD)
    bytes_accessed = (xp.size * 2 + w_slab.size * 2 + b_slab.size * 4
                      + B_pad * OUT_PAD * 4)

    grid_spec = pltpu.PrefetchScalarGridSpec(
        num_scalar_prefetch=0,
        grid=(n_tiles,),
        in_specs=[
            pl.BlockSpec((TM, IN_PAD), lambda i: (i, 0)),      # x: per batch tile
            pl.BlockSpec((W_ROWS, HIDDEN), lambda i: (0, 0)),  # weights: VMEM-resident
            pl.BlockSpec((8, HIDDEN), lambda i: (0, 0)),       # biases: VMEM-resident
        ],
        out_specs=pl.BlockSpec((TM, OUT_PAD), lambda i: (i, 0)),
    )

    out_pad = pl.pallas_call(
        _mlp_kernel,
        out_shape=jax.ShapeDtypeStruct((B_pad, OUT_PAD), jnp.float32),
        grid_spec=grid_spec,
        compiler_params=pltpu.CompilerParams(
            dimension_semantics=("parallel",)),   # batch tiles shard across v7x's 2 TCs
        cost_estimate=pl.CostEstimate(
            flops=flops, transcendentals=0, bytes_accessed=bytes_accessed),
    )(xp, w_slab, b_slab)

    return out_pad[:B, :out_size]


def furniture_model_forward(x, packed, *, tile_m=1024):
    """x: (B, in_size) f32 -> (B, out_size) f32 via one fused, jitted Pallas call."""
    return _forward_jit(x, packed["w_slab"], packed["b_slab"],
                        in_size=packed["in_size"], out_size=packed["out_size"],
                        tile_m=tile_m)


def reference_forward(x, params):
    """Pure-JAX reference mirroring the kernel numerics (bf16 operands, f32 acc)."""
    def dense(h, w, b):
        return jnp.dot(h.astype(jnp.bfloat16), w.astype(jnp.bfloat16),
                       preferred_element_type=jnp.float32) + b

    h1 = jnp.maximum(dense(x, params["w1"], params["b1"]), 0.0)
    h2 = jnp.maximum(dense(h1, params["w2"], params["b2"]), 0.0)
    return dense(h2, params["w3"], params["b3"])


if __name__ == "__main__":
    key = jax.random.PRNGKey(0)
    k_params, k_x = jax.random.split(key)

    input_size, output_size, batch = 14, 12, 8

    params = init_params(k_params, input_size=input_size, output_size=output_size)
    packed = pack_params(params)
    x = jax.random.normal(k_x, (batch, input_size), dtype=jnp.float32)

    out = jax.block_until_ready(furniture_model_forward(x, packed))

    ref = reference_forward(x, params)
    assert out.shape == (batch, output_size)
    assert jnp.allclose(out, ref, atol=1e-3, rtol=1e-3), float(
        jnp.max(jnp.abs(out - ref)))

    print("KERNEL_OK")
</pallas_src>

<mosaic_0001>
module attributes {stable_mosaic.version = 11 : i64} {
  func.func @_mlp_kernel(%arg0: i32, %arg1: memref<8x16xbf16, #tpu.memory_space<vmem>>, %arg2: memref<400x256xbf16, #tpu.memory_space<vmem>>, %arg3: memref<8x256xf32, #tpu.memory_space<vmem>>, %arg4: memref<8x128xf32, #tpu.memory_space<vmem>>) attributes {dimension_semantics = [#tpu.dimension_semantics<parallel>], iteration_bounds = array<i64: 1>, scalar_prefetch = 0 : i64, scratch_operands = 0 : i64, tpu.core_type = #tpu.core_type<tc>, window_params = [{transform_indices = @transform_0, window_bounds = array<i64: 8, 16>}, {pipeline_mode = #tpu.pipeline_mode<synchronous>, transform_indices = @transform_1, window_bounds = array<i64: 400, 256>}, {pipeline_mode = #tpu.pipeline_mode<synchronous>, transform_indices = @transform_2, window_bounds = array<i64: 8, 256>}, {transform_indices = @transform_3, window_bounds = array<i64: 8, 128>}]} {
    %c0 = arith.constant 0 : index
    %c0_0 = arith.constant 0 : index
    %0 = vector.load %arg1[%c0, %c0_0] : memref<8x16xbf16, #tpu.memory_space<vmem>>, vector<8x16xbf16>
    %c0_1 = arith.constant 0 : index
    %c0_2 = arith.constant 0 : index
    %1 = vector.load %arg2[%c0_1, %c0_2] : memref<400x256xbf16, #tpu.memory_space<vmem>>, vector<16x256xbf16>
    %cst = arith.constant dense<0.000000e+00> : vector<8x256xf32>
    %2 = tpu.matmul %0, %1, %cst {dimension_numbers = #tpu.dot_dimension_numbers<[1], [0], [0], [1], [0, 0, 1, 1], [], []>} : vector<8x16xbf16>, vector<16x256xbf16>, vector<8x256xf32> -> vector<8x256xf32>
    %c0_3 = arith.constant 0 : index
    %c0_4 = arith.constant 0 : index
    %3 = vector.load %arg3[%c0_3, %c0_4] : memref<8x256xf32, #tpu.memory_space<vmem>>, vector<1x256xf32>
    %4 = vector.broadcast %3 : vector<1x256xf32> to vector<8x256xf32>
    %5 = arith.addf %2, %4 : vector<8x256xf32>
    %cst_5 = arith.constant 0.000000e+00 : f32
    %6 = vector.broadcast %cst_5 : f32 to vector<8x256xf32>
    %7 = arith.maximumf %5, %6 : vector<8x256xf32>
    %8 = arith.truncf %7 : vector<8x256xf32> to vector<8x256xbf16>
    %c16 = arith.constant 16 : index
    %c0_6 = arith.constant 0 : index
    %9 = vector.load %arg2[%c16, %c0_6] : memref<400x256xbf16, #tpu.memory_space<vmem>>, vector<256x256xbf16>
    %cst_7 = arith.constant dense<0.000000e+00> : vector<8x256xf32>
    %10 = tpu.matmul %8, %9, %cst_7 {dimension_numbers = #tpu.dot_dimension_numbers<[1], [0], [0], [1], [0, 0, 1, 1], [], []>} : vector<8x256xbf16>, vector<256x256xbf16>, vector<8x256xf32> -> vector<8x256xf32>
    %c1 = arith.constant 1 : index
    %c0_8 = arith.constant 0 : index
    %11 = vector.load %arg3[%c1, %c0_8] : memref<8x256xf32, #tpu.memory_space<vmem>>, vector<1x256xf32>
    %12 = vector.broadcast %11 : vector<1x256xf32> to vector<8x256xf32>
    %13 = arith.addf %10, %12 : vector<8x256xf32>
    %cst_9 = arith.constant 0.000000e+00 : f32
    %14 = vector.broadcast %cst_9 : f32 to vector<8x256xf32>
    %15 = arith.maximumf %13, %14 : vector<8x256xf32>
    %16 = arith.truncf %15 : vector<8x256xf32> to vector<8x256xbf16>
    %c272 = arith.constant 272 : index
    %c0_10 = arith.constant 0 : index
    %17 = vector.load %arg2[%c272, %c0_10] : memref<400x256xbf16, #tpu.memory_space<vmem>>, vector<128x256xbf16>
    %18 = vector.extract_strided_slice %16 {offsets = [0, 0], sizes = [8, 128], strides = [1, 1]} : vector<8x256xbf16> to vector<8x128xbf16>
    %19 = vector.extract_strided_slice %17 {offsets = [0, 0], sizes = [128, 128], strides = [1, 1]} : vector<128x256xbf16> to vector<128x128xbf16>
    %cst_11 = arith.constant dense<0.000000e+00> : vector<8x128xf32>
    %20 = tpu.matmul %18, %19, %cst_11 {dimension_numbers = #tpu.dot_dimension_numbers<[1], [0], [0], [1], [0, 0, 1, 1], [], []>} : vector<8x128xbf16>, vector<128x128xbf16>, vector<8x128xf32> -> vector<8x128xf32>
    %21 = vector.extract_strided_slice %16 {offsets = [0, 128], sizes = [8, 128], strides = [1, 1]} : vector<8x256xbf16> to vector<8x128xbf16>
    %22 = vector.extract_strided_slice %17 {offsets = [0, 128], sizes = [128, 128], strides = [1, 1]} : vector<128x256xbf16> to vector<128x128xbf16>
    %cst_12 = arith.constant dense<0.000000e+00> : vector<8x128xf32>
    %23 = tpu.matmul %21, %22, %cst_12 {dimension_numbers = #tpu.dot_dimension_numbers<[1], [0], [0], [1], [0, 0, 1, 1], [], []>} : vector<8x128xbf16>, vector<128x128xbf16>, vector<8x128xf32> -> vector<8x128xf32>
    %24 = arith.addf %20, %23 : vector<8x128xf32>
    %c2 = arith.constant 2 : index
    %c0_13 = arith.constant 0 : index
    %25 = vector.load %arg3[%c2, %c0_13] : memref<8x256xf32, #tpu.memory_space<vmem>>, vector<1x128xf32>
    %26 = vector.broadcast %25 : vector<1x128xf32> to vector<8x128xf32>
    %27 = arith.addf %24, %26 : vector<8x128xf32>
    %c0_14 = arith.constant 0 : index
    %c0_15 = arith.constant 0 : index
    %28 = vector.load %arg4[%c0_14, %c0_15] : memref<8x128xf32, #tpu.memory_space<vmem>>, vector<8x128xf32>
    tpu.vector_store %arg4[%c0_14, %c0_15], %27 {strides = array<i32>} : memref<8x128xf32, #tpu.memory_space<vmem>>, vector<8x128xf32>,
    return
  }
  func.func @transform_0(%arg0: i32) -> (i32, i32) {
    %c0_i32 = arith.constant 0 : i32
    %c0_i32_0 = arith.constant 0 : i32
    return %arg0, %c0_i32 : i32, i32
  }
  func.func @transform_1(%arg0: i32) -> (i32, i32) {
    %c0_i32 = arith.constant 0 : i32
    %c0_i32_0 = arith.constant 0 : i32
    %c0_i32_1 = arith.constant 0 : i32
    return %c0_i32, %c0_i32_0 : i32, i32
  }
  func.func @transform_2(%arg0: i32) -> (i32, i32) {
    %c0_i32 = arith.constant 0 : i32
    %c0_i32_0 = arith.constant 0 : i32
    %c0_i32_1 = arith.constant 0 : i32
    return %c0_i32, %c0_i32_0 : i32, i32
  }
  func.func @transform_3(%arg0: i32) -> (i32, i32) {
    %c0_i32 = arith.constant 0 : i32
    %c0_i32_0 = arith.constant 0 : i32
    return %arg0, %c0_i32 : i32, i32
  }
}

</mosaic_0001>

<bundles_post_ra>
// kernel: _forward_jit.1
= control target key start
LH: loop header
LB: loop body
LE: loop exit
PB: predicated region body
PF: predicated region fallthrough
CT: control target
= control target key end

     0   :  { %8 = vsyncpa [#allocation3], 0  ;;  %s838_s0 = inlined_call_operand.vmem [shape: bf16[8,16], index: 0, kind: input, shape index: {}]   ;;  %s839_s1 = inlined_call_operand.hbm [shape: bf16[400,256], index: 1, kind: input, shape index: {}]   ;;  %s840_s2 = inlined_call_operand.vmem [shape: f32[8,256], index: 2, kind: input, shape index: {}]   ;;  %s841_s3 = inlined_call_operand.hbm [shape: f32[8,128], index: 3, kind: output, shape index: {}]  }
   0x1   :  { %9 = vsyncpa [#allocation4], 0  ;;  %s16_s14 = sshll.u32 %s839_s1, 4  ;;  %s794_s15 = smov [#allocation2]   ;;  %s17_s14 = int_to_ptr.hbm [resolvable:$true] %s16_s14 }
   0x2   :  { %s18_s16 = sshll.u32 %s794_s15, 4  ;;  %s795_s17 = smov 128   ;;  %s19_s16 = int_to_ptr.vmem [resolvable:$true] %s18_s16 }
   0x3   :  { %s796_s18 = smov 8  }
   0x4   :  { %24 = dma.hbm_to_vmem [thread:$0]  %s17_s14, 6400, %s19_s16, [#allocation3], %s795_s17, %s795_s17, %s796_s18  }
   0x5   :  { %790 = dma.done.wait [#allocation3], 6400  }
   0x6   :  { %791 = vsyncadd [#allocation3], 4294960896  ;;  %vm51_vm0 = vcmask 130048   ;;  %v487_v0 = vld [vmem:[#allocation2] sm:$0xf]  ;;  %s797_s25 = smov [#allocation5]  }
   0x7   :  { %v689_v1 = vld [vmem:[#allocation2 + $0x4] sm:$0xf0]  ;;  %v688_v2 = vld [vmem:[#allocation2 + $0x4] sm:$0xf]  ;;  %v489_v4 = vld [vmem:[#allocation2 + $0x8] sm:$0xf0] }
   0x8   :  { %v488_v3 = vor.u32 %v689_v1, %v487_v0  ;;  %v32_v5 = vld [vmem:[%s838_s0] sm:$0xf]  ;;  %v492_v7 = vor.u32 %v688_v2, %v489_v4  ;;  %v705_v8 = vld [vmem:[#allocation2 + $0x84] sm:$0xf0]  ;;  %v704_v13 = vld [vmem:[#allocation2 + $0x84] sm:$0xf] }
   0x9   :  { %v554_v6 = vld [vmem:[#allocation2 + $0x80] sm:$0xf]  ;;  %v721_v10 = vld [vmem:[#allocation2 + $0x104] sm:$0xf0]  ;;  %v556_v14 = vld [vmem:[#allocation2 + $0x88] sm:$0xf0] }
   0xa   :  { %v618_v9 = vld [vmem:[#allocation2 + $0x100] sm:$0xf]  ;;  %62 = vmatpush.bf16.msra.mxu0 %v488_v3  ;;  %v555_v11 = vor.u32 %v705_v8, %v554_v6  ;;  %v720_v15 = vld [vmem:[#allocation2 + $0x104] sm:$0xf]  ;;  %75 = vmatpush.bf16.msra.mxu1 %v492_v7  ;;  %v559_v16 = vor.u32 %v704_v13, %v556_v14  ;;  %v620_v17 = vld [vmem:[#allocation2 + $0x108] sm:$0xf0] }
   0xb   :  { %v619_v12 = vor.u32 %v721_v10, %v618_v9  ;;  %v546_v18 = vld [vmem:[#allocation2 + $0x70] sm:$0xf]  ;;  %v703_v19 = vld [vmem:[#allocation2 + $0x74] sm:$0xf0]  ;;  %v623_v20 = vor.u32 %v720_v15, %v620_v17  ;;  %v702_v24 = vld [vmem:[#allocation2 + $0x74] sm:$0xf] }
   0xc   :  { %284 = vmatpush.bf16.msra.mxu2 %v555_v11  ;;  %v547_v21 = vor.u32 %v703_v19, %v546_v18  ;;  %v610_v22 = vld [vmem:[#allocation2 + $0xf0] sm:$0xf]  ;;  %v719_v23 = vld [vmem:[#allocation2 + $0xf4] sm:$0xf0]  ;;  %v548_v26 = vld [vmem:[#allocation2 + $0x78] sm:$0xf0] }
   0xd   :  { %297 = vmatpush.bf16.msra.mxu3 %v619_v12  ;;  %493 = vmatmul.msk.bf16.vlgmr.msra.gmra.mxu0 %vm51_vm0, %v32_v5  ;;  %v611_v25 = vor.u32 %v719_v23, %v610_v22  ;;  %v718_v27 = vld [vmem:[#allocation2 + $0xf4] sm:$0xf]  ;;  %v612_v28 = vld [vmem:[#allocation2 + $0xf8] sm:$0xf0]  ;;  %v551_v29 = vor.u32 %v702_v24, %v548_v26  ;;  %v538_v30 = vld [vmem:[#allocation2 + $0x60] sm:$0xf] }
   0xe   :  { %494 = vmatmul.msk.bf16.vlgmr.msra.gmra.mxu1 %vm51_vm0, %v32_v5  ;;  %310 = vmatpush.bf16.msrb.mxu0 %v559_v16  ;;  %v701_v31 = vld [vmem:[#allocation2 + $0x64] sm:$0xf0]  ;;  %v602_v32 = vld [vmem:[#allocation2 + $0xe0] sm:$0xf]  ;;  %v615_v33 = vor.u32 %v718_v27, %v612_v28  ;;  %v700_v35 = vld [vmem:[#allocation2 + $0x64] sm:$0xf] }
   0xf   :  { %323 = vmatpush.bf16.msrb.mxu1 %v623_v20  ;;  %v717_v34 = vld [vmem:[#allocation2 + $0xe4] sm:$0xf0]  ;;  %v540_v36 = vld [vmem:[#allocation2 + $0x68] sm:$0xf0]  ;;  %v539_v37 = vor.u32 %v701_v31, %v538_v30  ;;  %v716_v39 = vld [vmem:[#allocation2 + $0xe4] sm:$0xf] }
  0x10   :  { %285 = vmatpush.bf16.msra.mxu2 %v547_v21  ;;  %v603_v38 = vor.u32 %v717_v34, %v602_v32  ;;  %v604_v40 = vld [vmem:[#allocation2 + $0xe8] sm:$0xf0]  ;;  %v530_v41 = vld [vmem:[#allocation2 + $0x50] sm:$0xf]  ;;  %v699_v42 = vld [vmem:[#allocation2 + $0x54] sm:$0xf0]  ;;  %v543_v45 = vor.u32 %v700_v35, %v540_v36 }
  0x11   :  { %298 = vmatpush.bf16.msra.mxu3 %v611_v25  ;;  %v594_v43 = vld [vmem:[#allocation2 + $0xd0] sm:$0xf]  ;;  %v715_v44 = vld [vmem:[#allocation2 + $0xd4] sm:$0xf0]  ;;  %v607_v46 = vor.u32 %v716_v39, %v604_v40  ;;  %v698_v47 = vld [vmem:[#allocation2 + $0x54] sm:$0xf]  ;;  %v531_v49 = vor.u32 %v699_v42, %v530_v41 }
  0x12   :  { %311 = vmatpush.bf16.msrb.mxu0 %v551_v29  ;;  %v532_v48 = vld [vmem:[#allocation2 + $0x58] sm:$0xf0]  ;;  %v595_v50 = vor.u32 %v715_v44, %v594_v43  ;;  %v714_v51 = vld [vmem:[#allocation2 + $0xd4] sm:$0xf]  ;;  %v522_v53 = vld [vmem:[#allocation2 + $0x40] sm:$0xf] }
  0x13   :  { %324 = vmatpush.bf16.msrb.mxu1 %v615_v33  ;;  %v596_v52 = vld [vmem:[#allocation2 + $0xd8] sm:$0xf0]  ;;  %v697_v54 = vld [vmem:[#allocation2 + $0x44] sm:$0xf0]  ;;  %v586_v55 = vld [vmem:[#allocation2 + $0xc0] sm:$0xf]  ;;  %v535_v57 = vor.u32 %v698_v47, %v532_v48 }
  0x14   :  { %286 = vmatpush.bf16.msra.mxu2 %v539_v37  ;;  %v713_v56 = vld [vmem:[#allocation2 + $0xc4] sm:$0xf0]  ;;  %v599_v58 = vor.u32 %v714_v51, %v596_v52  ;;  %v696_v59 = vld [vmem:[#allocation2 + $0x44] sm:$0xf]  ;;  %v524_v60 = vld [vmem:[#allocation2 + $0x48] sm:$0xf0]  ;;  %v523_v61 = vor.u32 %v697_v54, %v522_v53 }
  0x15   :  { %299 = vmatpush.bf16.msra.mxu3 %v603_v38  ;;  %v587_v62 = vor.u32 %v713_v56, %v586_v55  ;;  %v712_v63 = vld [vmem:[#allocation2 + $0xc4] sm:$0xf]  ;;  %v588_v0 = vld [vmem:[#allocation2 + $0xc8] sm:$0xf0]  ;;  %v514_v1 = vld [vmem:[#allocation2 + $0x30] sm:$0xf]  ;;  %v527_v5 = vor.u32 %v696_v59, %v524_v60 }
  0x16   :  { %312 = vmatpush.bf16.msrb.mxu0 %v543_v45  ;;  %v695_v2 = vld [vmem:[#allocation2 + $0x34] sm:$0xf0]  ;;  %v578_v3 = vld [vmem:[#allocation2 + $0xb0] sm:$0xf]  ;;  %v591_v6 = vor.u32 %v712_v63, %v588_v0  ;;  %v694_v7 = vld [vmem:[#allocation2 + $0x34] sm:$0xf] }
  0x17   :  { %325 = vmatpush.bf16.msrb.mxu1 %v607_v46  ;;  %v711_v4 = vld [vmem:[#allocation2 + $0xb4] sm:$0xf0]  ;;  %v516_v8 = vld [vmem:[#allocation2 + $0x38] sm:$0xf0]  ;;  %v515_v9 = vor.u32 %v695_v2, %v514_v1  ;;  %v710_v11 = vld [vmem:[#allocation2 + $0xb4] sm:$0xf] }
  0x18   :  { %287 = vmatpush.bf16.msra.mxu2 %v531_v49  ;;  %v579_v10 = vor.u32 %v711_v4, %v578_v3  ;;  %v580_v12 = vld [vmem:[#allocation2 + $0xb8] sm:$0xf0]  ;;  %v519_v13 = vor.u32 %v694_v7, %v516_v8  ;;  %v506_v15 = vld [vmem:[#allocation2 + $0x20] sm:$0xf]  ;;  %v693_v16 = vld [vmem:[#allocation2 + $0x24] sm:$0xf0] }
  0x19   :  { %300 = vmatpush.bf16.msra.mxu3 %v595_v50  ;;  %v583_v14 = vor.u32 %v710_v11, %v580_v12  ;;  %v570_v17 = vld [vmem:[#allocation2 + $0xa0] sm:$0xf]  ;;  %v507_v18 = vor.u32 %v693_v16, %v506_v15  ;;  %v709_v19 = vld [vmem:[#allocation2 + $0xa4] sm:$0xf0]  ;;  %v692_v20 = vld [vmem:[#allocation2 + $0x24] sm:$0xf] }
  0x1a   :  { %313 = vmatpush.bf16.msrb.mxu0 %v535_v57  ;;  %v508_v21 = vld [vmem:[#allocation2 + $0x28] sm:$0xf0]  ;;  %v571_v22 = vor.u32 %v709_v19, %v570_v17  ;;  %v708_v24 = vld [vmem:[#allocation2 + $0xa4] sm:$0xf]  ;;  %v498_v27 = vld [vmem:[#allocation2 + $0x10] sm:$0xf] }
  0x1b   :  { %326 = vmatpush.bf16.msrb.mxu1 %v599_v58  ;;  %v511_v23 = vor.u32 %v692_v20, %v508_v21  ;;  %v572_v25 = vld [vmem:[#allocation2 + $0xa8] sm:$0xf0]  ;;  %v691_v28 = vld [vmem:[#allocation2 + $0x14] sm:$0xf0]  ;;  %v562_v29 = vld [vmem:[#allocation2 + $0x90] sm:$0xf] }
  0x1c   :  { %288 = vmatpush.bf16.msra.mxu2 %v523_v61  ;;  %v575_v26 = vor.u32 %v708_v24, %v572_v25  ;;  %v499_v30 = vor.u32 %v691_v28, %v498_v27  ;;  %v707_v31 = vld [vmem:[#allocation2 + $0x94] sm:$0xf0]  ;;  %v690_v32 = vld [vmem:[#allocation2 + $0x14] sm:$0xf]  ;;  %v500_v33 = vld [vmem:[#allocation2 + $0x18] sm:$0xf0] }
  0x1d   :  { %301 = vmatpush.bf16.msra.mxu3 %v587_v62  ;;  %v563_v34 = vor.u32 %v707_v31, %v562_v29  ;;  %v503_v35 = vor.u32 %v690_v32, %v500_v33  ;;  %v706_v36 = vld [vmem:[#allocation2 + $0x94] sm:$0xf]  ;;  %v564_v37 = vld [vmem:[#allocation2 + $0x98] sm:$0xf0]  ;;  %v686_v39 = vld [vmem:[#allocation2 + $0x180] sm:$0xf] }
  0x1e   :  { %314 = vmatpush.bf16.msrb.mxu0 %v527_v5  ;;  %v567_v38 = vor.u32 %v706_v36, %v564_v37  ;;  %v737_v40 = vld [vmem:[#allocation2 + $0x184] sm:$0xf0]  ;;  %v736_v41 = vld [vmem:[#allocation2 + $0x184] sm:$0xf]  ;;  %v652_v43 = vld [vmem:[#allocation2 + $0x188] sm:$0xf0] }
  0x1f   :  { %327 = vmatpush.bf16.msrb.mxu1 %v591_v6  ;;  %v687_v42 = vor.u32 %v737_v40, %v686_v39  ;;  %v682_v44 = vld [vmem:[#allocation2 + $0x170] sm:$0xf]  ;;  %v735_v45 = vld [vmem:[#allocation2 + $0x174] sm:$0xf0]  ;;  %v655_v46 = vor.u32 %v736_v41, %v652_v43  ;;  %v734_v47 = vld [vmem:[#allocation2 + $0x174] sm:$0xf] }
  0x20   :  { %289 = vmatpush.bf16.msra.mxu2 %v515_v9  ;;  %v648_v48 = vld [vmem:[#allocation2 + $0x178] sm:$0xf0]  ;;  %v683_v49 = vor.u32 %v735_v45, %v682_v44  ;;  %v678_v51 = vld [vmem:[#allocation2 + $0x160] sm:$0xf]  ;;  %v733_v52 = vld [vmem:[#allocation2 + $0x164] sm:$0xf0] }
  0x21   :  { %302 = vmatpush.bf16.msra.mxu3 %v579_v10  ;;  %v651_v50 = vor.u32 %v734_v47, %v648_v48  ;;  %v732_v53 = vld [vmem:[#allocation2 + $0x164] sm:$0xf]  ;;  %v644_v54 = vld [vmem:[#allocation2 + $0x168] sm:$0xf0]  ;;  %v679_v55 = vor.u32 %v733_v52, %v678_v51  ;;  %v674_v57 = vld [vmem:[#allocation2 + $0x150] sm:$0xf] }
  0x22   :  { %315 = vmatpush.bf16.msrb.mxu0 %v519_v13  ;;  %v647_v56 = vor.u32 %v732_v53, %v644_v54  ;;  %v731_v58 = vld [vmem:[#allocation2 + $0x154] sm:$0xf0]  ;;  %v35_v60 = vld [vmem:[%s840_s2] ss:$8 sm:$0x3]  ;;  %s473_s26 = sshll.u32 %s797_s25, 4  ;;  %s474_s26 = int_to_ptr.vmem [resolvable:$true] %s473_s26 }
  0x23   :  { %328 = vmatpush.bf16.msrb.mxu1 %v583_v14  ;;  %v675_v59 = vor.u32 %v731_v58, %v674_v57  ;;  %v37_v61 = vperm.slane %v35_v60, 0  ;;  %v38_v62 = vperm.slane %v35_v60, 1  ;;  %v730_v9 = vld [vmem:[#allocation2 + $0x154] sm:$0xf]  ;;  %v640_v10 = vld [vmem:[#allocation2 + $0x158] sm:$0xf0] }
  0x24   :  { %290 = vmatpush.bf16.msra.mxu2 %v507_v18  ;;  %v670_v11 = vld [vmem:[#allocation2 + $0x140] sm:$0xf]  ;;  %v643_v12 = vor.u32 %v730_v9, %v640_v10  ;;  %v729_v13 = vld [vmem:[#allocation2 + $0x144] sm:$0xf0]  ;;  %v728_v15 = vld [vmem:[#allocation2 + $0x144] sm:$0xf] }
  0x25   :  { %303 = vmatpush.bf16.msra.mxu3 %v571_v22  ;;  %v671_v14 = vor.u32 %v729_v13, %v670_v11  ;;  %v636_v16 = vld [vmem:[#allocation2 + $0x148] sm:$0xf0]  ;;  %v666_v17 = vld [vmem:[#allocation2 + $0x130] sm:$0xf]  ;;  %v727_v19 = vld [vmem:[#allocation2 + $0x134] sm:$0xf0] }
  0x26   :  { %316 = vmatpush.bf16.msrb.mxu0 %v511_v23  ;;  %v639_v18 = vor.u32 %v728_v15, %v636_v16  ;;  %v667_v20 = vor.u32 %v727_v19, %v666_v17  ;;  %v726_v21 = vld [vmem:[#allocation2 + $0x134] sm:$0xf]  ;;  %v632_v22 = vld [vmem:[#allocation2 + $0x138] sm:$0xf0]  ;;  %v662_v23 = vld [vmem:[#allocation2 + $0x120] sm:$0xf] }
  0x27   :  { %329 = vmatpush.bf16.msrb.mxu1 %v575_v26  ;;  %v635_v24 = vor.u32 %v726_v21, %v632_v22  ;;  %v725_v25 = vld [vmem:[#allocation2 + $0x124] sm:$0xf0]  ;;  %v724_v27 = vld [vmem:[#allocation2 + $0x124] sm:$0xf]  ;;  %v628_v28 = vld [vmem:[#allocation2 + $0x128] sm:$0xf0] }
  0x28   :  { %291 = vmatpush.bf16.msra.mxu2 %v499_v30  ;;  %v663_v26 = vor.u32 %v725_v25, %v662_v23  ;;  %v658_v29 = vld [vmem:[#allocation2 + $0x110] sm:$0xf]  ;;  %v631_v30 = vor.u32 %v724_v27, %v628_v28  ;;  %v723_v31 = vld [vmem:[#allocation2 + $0x114] sm:$0xf0]  ;;  %v722_v33 = vld [vmem:[#allocation2 + $0x114] sm:$0xf] }
  0x29   :  { %304 = vmatpush.bf16.msra.mxu3 %v563_v34  ;;  %v659_v32 = vor.u32 %v723_v31, %v658_v29  ;;  %v624_v34 = vld [vmem:[#allocation2 + $0x118] sm:$0xf0]  ;;  %v495_v36 = vld [vmem:[%s840_s2 + $0x1] ss:$8 sm:$0x3]  ;;  %s475_s29 = sshll.u32 %s841_s3, 4  ;;  %s476_s29 = int_to_ptr.hbm [resolvable:$true] %s475_s29 }
  0x2a   :  { %317 = vmatpush.bf16.msrb.mxu0 %v503_v35  ;;  %v627_v35 = vor.u32 %v722_v33, %v624_v34  ;;  %v121_v37 = vperm.slane %v495_v36, 1  ;;  %v120_v41 = vperm.slane %v495_v36, 0  ;;  %v465_v58 = vld [vmem:[%s840_s2 + $0x2] ss:$0 sm:$0xff] }
  0x2b   :  { %330 = vmatpush.bf16.msrb.mxu1 %v567_v38 }
  0x2c   :  { %407 = vmatpush.bf16.msrb.mxu2 %v655_v46 }
  0x2d   :  { %452 = vmatpush.bf16.msrb.mxu3 %v687_v42 }
  0x30   :  { %408 = vmatpush.bf16.msrb.mxu2 %v651_v50 }
  0x31   :  { %453 = vmatpush.bf16.msrb.mxu3 %v683_v49 }
  0x34   :  { %409 = vmatpush.bf16.msrb.mxu2 %v647_v56 }
  0x35   :  { %454 = vmatpush.bf16.msrb.mxu3 %v679_v55 }
  0x38   :  { %410 = vmatpush.bf16.msrb.mxu2 %v643_v12 }
  0x39   :  { %455 = vmatpush.bf16.msrb.mxu3 %v675_v59 }
  0x3c   :  { %411 = vmatpush.bf16.msrb.mxu2 %v639_v18 }
  0x3d   :  { %456 = vmatpush.bf16.msrb.mxu3 %v671_v14 }
  0x40   :  { %412 = vmatpush.bf16.msrb.mxu2 %v635_v24 }
  0x41   :  { %457 = vmatpush.bf16.msrb.mxu3 %v667_v20 }
  0x44   :  { %413 = vmatpush.bf16.msrb.mxu2 %v631_v30 }
  0x45   :  { %458 = vmatpush.bf16.msrb.mxu3 %v663_v26 }
  0x48   :  { %414 = vmatpush.bf16.msrb.mxu2 %v627_v35 }
  0x49   :  { %459 = vmatpush.bf16.msrb.mxu3 %v659_v32 }
  0x8a   :  { %v64_v63 = vpop.f32.mrf.mxu0 }
  0x8b   :  { %v65_v0 = vadd.f32 %v64_v63, %v37_v61  ;;  %v77_v1 = vpop.f32.mrf.mxu1 }
  0x8c   :  { %v78_v2 = vadd.f32 %v77_v1, %v38_v62 }
  0x8d   :  { %v81_v3 = vmax.f32 %v65_v0, 0.0 }
  0x8e   :  { %v82_v4 = vmax.f32 %v78_v2, 0.0 }
  0x8f   :  { %v83_v5 = vpack.c.bf16 %v81_v3, %v81_v3 }
  0x90   :  { %v84_v6 = vpack.c.bf16 %v82_v4, %v82_v4 }
  0x91   :  { %292 = vmatmul.bf16.vlgmr.msra.gmra.mxu2 %v83_v5  ;;  %318 = vmatmul.bf16.vlgmr.msrb.gmra.mxu0 %v83_v5 }
  0x92   :  { %305 = vmatmul.bf16.vlgmr.msra.gmra.mxu3 %v84_v6  ;;  %331 = vmatmul.bf16.vlgmr.msrb.gmra.mxu1 %v84_v6  ;;  %v66_v7 = vpop.f32.mrf.mxu0 }
  0x93   :  { %v79_v8 = vpop.f32.mrf.mxu1 }
 0x10e   :  { %v319_v38 = vpop.f32.mrf.mxu0 }
 0x10f   :  { %v332_v39 = vpop.f32.mrf.mxu1  ;;  %v320_v40 = vadd.f32 %v319_v38, %v121_v37 }
 0x111   :  { %v333_v43 = vadd.f32 %v332_v39, %v320_v40 }
 0x113   :  { %v337_v49 = vmax.f32 %v333_v43, 0.0 }
 0x114   :  { %v293_v42 = vpop.f32.mrf.mxu2 }
 0x115   :  { %v294_v44 = vadd.f32 %v293_v42, %v120_v41  ;;  %v306_v45 = vpop.f32.mrf.mxu3 }
 0x116   :  { %v321_v46 = vpop.f32.mrf.mxu0 }
 0x117   :  { %v307_v47 = vadd.f32 %v306_v45, %v294_v44  ;;  %v334_v48 = vpop.f32.mrf.mxu1 }
 0x119   :  { %v336_v50 = vmax.f32 %v307_v47, 0.0 }
 0x11b   :  { %v338_v51 = vpack.c.bf16 %v337_v49, %v336_v50 }
 0x11c   :  { %v295_v52 = vpop.f32.mrf.mxu2 }
 0x11d   :  { %v308_v53 = vpop.f32.mrf.mxu3  ;;  %460 = vmatmul.bf16.vlgmr.msrb.gmra.mxu3 %v338_v51  ;;  %v356_v54 = vunpack.c.h.b16 %v338_v51 }
 0x11f   :  { %v357_v55 = vpack.c.b16 %v356_v54, %v356_v54 }
 0x121   :  { %415 = vmatmul.bf16.vlgmr.msrb.gmra.mxu2 %v357_v55 }
 0x1a0   :  { %v461_v56 = vpop.f32.mrf.mxu3 }
 0x1a4   :  { %v416_v57 = vpop.f32.mrf.mxu2 }
 0x1a5   :  { %v462_v59 = vadd.f32 %v461_v56, %v416_v57 }
 0x1a7   :  { %v466_v60 = vadd.f32 %v465_v58, %v462_v59 }
 0x1a8   :  { %v463_v61 = vpop.f32.mrf.mxu3 }
 0x1a9   :  { %467 = vst [vmem:[#allocation5] sm:$0xff] %v466_v60 }
 0x1aa   :  { %478 = dma.vmem_to_hbm [thread:$0]  %s474_s26, 128, %s476_s29, [#allocation4]  }
 0x1ac   :  { %v418_v62 = vpop.f32.mrf.mxu2 }
 0x1ad   :  { %792 = dma.done.wait [#allocation4], 128  }
 0x1ae   :  { %793 = vsyncadd [#allocation4], 4294967168 }
 0x1af   :  { %483 = vsyncpa [#allocation3], 1 }
 0x1b0   :  { %484 = vsyncpa [#allocation4], 1 }

</bundles_post_ra>
